<compile_context>
chip_gen: v7x
topology: tpu7x:2x2x1
jax: 0.10.0
libtpu: 0.0.40
codegen_flags: <defaults>
</compile_context>

<pallas_src>
import numpy as np
import jax
import jax.numpy as jnp
from jax import lax
from jax.experimental import pallas as pl
from jax.experimental.pallas import tpu as pltpu

# ---- model hyper-parameters (from the PyTorch module) ----
K = 10            # GPR_prop K
ALPHA = 0.9       # GPR_prop alpha
HIDDEN = 128      # lin1 output features
NUM_CLASSES = 5   # lin2 output features
CPAD = 128        # class dim padded to one full lane register
MIB = 1024 * 1024


# --------------------------------------------------------------------------
# Kernel 1: row-parallel MLP  (dropout -> lin1 -> ReLU -> dropout -> lin2)
#           output z0 in bf16 (feeds the propagation kernel's MXU directly).
# --------------------------------------------------------------------------
def mlp_kernel(x_ref, w1t_ref, b1_ref, w2t_ref, b2_ref, z_ref):
    # dropout (p=0.5) is identity at inference time
    h = jnp.dot(x_ref[...], w1t_ref[...],
                preferred_element_type=jnp.float32) + b1_ref[...]
    h = jnp.maximum(h, 0.0)
    # dropout (p=0.5) identity; lin2 with class dim zero-padded to 128 lanes
    z = jnp.dot(h.astype(jnp.bfloat16), w2t_ref[...],
                preferred_element_type=jnp.float32) + b2_ref[...]
    z_ref[...] = z.astype(jnp.bfloat16)


def _masked_log_softmax(h):
    """log_softmax over the first NUM_CLASSES lanes of a (rows, CPAD) array."""
    lane = lax.broadcasted_iota(jnp.int32, h.shape, 1)
    valid = lane < NUM_CLASSES
    hm = jnp.where(valid, h, -1e30)
    m = jnp.max(hm, axis=1, keepdims=True)
    s = hm - m
    e = jnp.where(valid, jnp.exp(s), 0.0)
    lse = jnp.log(jnp.sum(e, axis=1, keepdims=True))
    return s - lse


# --------------------------------------------------------------------------
# Kernel 2a (resident path): adjacency resident in VMEM, K hops + log_softmax
#            in a single un-gridded invocation.  Adjacency is read from HBM
#            exactly once.
# --------------------------------------------------------------------------
def prop_resident_kernel(temp_ref,   # SMEM (K+1,) f32 : GPR gammas
                         z0_ref,     # VMEM (N, CPAD) bf16 : lin2 output
                         adj_ref,    # VMEM (N, N) bf16 : normalized adjacency
                         out_ref,    # VMEM (N, CPAD) f32 : hidden -> logits
                         zbuf_ref):  # scratch (N, CPAD) bf16 : current z
    z0 = z0_ref[...]
    zbuf_ref[...] = z0
    out_ref[...] = temp_ref[0] * z0.astype(jnp.float32)   # hidden accumulator
    for k in range(K):                                     # static unroll (K=10)
        z_new = jnp.dot(adj_ref[...], zbuf_ref[...],
                        preferred_element_type=jnp.float32)
        out_ref[...] = out_ref[...] + temp_ref[k + 1] * z_new
        if k < K - 1:
            zbuf_ref[...] = z_new.astype(jnp.bfloat16)
    out_ref[...] = _masked_log_softmax(out_ref[...])


# --------------------------------------------------------------------------
# Kernel 2b (streamed path): adjacency streamed one (TM, N) row block per grid
#            step; z ping-pong + hidden accumulator persistent in VMEM scratch.
# --------------------------------------------------------------------------
def prop_stream_kernel(temp_ref,     # SMEM (K+1,) f32 : GPR gammas
                       z0_ref,       # VMEM (N, CPAD) bf16 : lin2 output (resident)
                       adj_ref,      # VMEM (TM, N) bf16 : adjacency row block
                       out_ref,      # VMEM (TM, CPAD) f32 : log-softmax output
                       zbuf_ref,     # scratch (2N, CPAD) bf16 : ping-pong z
                       hid_ref):     # scratch (N, CPAD) f32 : gamma-weighted sum
    k = pl.program_id(0)                      # propagation step (sequential)
    j = pl.program_id(1)                      # destination row block
    k_last = pl.num_programs(0) - 1
    tm, n = adj_ref.shape

    # One-time init: seed the ping-pong buffer and the hidden accumulator.
    @pl.when(jnp.logical_and(k == 0, j == 0))
    def _():
        z0 = z0_ref[...]
        zbuf_ref[pl.ds(0, n), :] = z0
        hid_ref[...] = temp_ref[0] * z0.astype(jnp.float32)

    src = k % 2
    dst = 1 - src
    row0 = pl.multiple_of(j * tm, tm)
    src0 = pl.multiple_of(src * n, tm)
    dst0 = pl.multiple_of(dst * n + j * tm, tm)

    # z_new[block] = A_hat[block, :] @ z_old     (bf16 MXU, f32 accumulation)
    z_new = jnp.dot(adj_ref[...], zbuf_ref[pl.ds(src0, n), :],
                    preferred_element_type=jnp.float32)
    zbuf_ref[pl.ds(dst0, tm), :] = z_new.astype(jnp.bfloat16)

    # hidden += gamma_k * z_new   (f32 accumulator scratch)
    gamma = temp_ref[k + 1]
    h_new = hid_ref[pl.ds(row0, tm), :] + gamma * z_new
    hid_ref[pl.ds(row0, tm), :] = h_new

    # Epilogue on the last step only: masked log_softmax, lane-dense store.
    # (The output index map pins the block to (0,0) for k < K-1, so nothing is
    #  flushed to HBM until the last propagation step.)
    @pl.when(k == k_last)
    def _():
        out_ref[...] = _masked_log_softmax(h_new)


# --------------------------------------------------------------------------
# VMEM budgeting / tiling decisions (per TPU generation)
# --------------------------------------------------------------------------
def _vmem_budget_bytes():
    phys = None
    try:
        info = pltpu.get_tpu_info()
        cap = getattr(info, "vmem_capacity_bytes", None)
        if cap:
            phys = int(cap)
    except Exception:
        phys = None
    if not phys:
        kind = jax.devices()[0].device_kind.lower()
        phys = 64 * MIB if ("v7" in kind or "7x" in kind) else 128 * MIB
    if phys >= 128 * MIB:
        return 104 * MIB                      # v5e / v6e: 128 MiB physical
    return max(phys - 12 * MIB, phys // 2)    # v7x: stay well under 64 MiB


def _resident_need_bytes(n):
    return (n * n * 2            # bf16 adjacency, single-buffered (no grid)
            + n * CPAD * 2       # bf16 z0 input
            + n * CPAD * 4       # f32 hidden / logits output
            + n * CPAD * 2       # bf16 z scratch
            + 4 * MIB)           # Mosaic internal scratch headroom


def _stream_need_bytes(n, tm):
    return (2 * n * CPAD * 2     # bf16 z0 input (count 2 buffers to be safe)
            + 2 * n * CPAD * 2   # bf16 ping-pong z scratch
            + n * CPAD * 4       # f32 hidden accumulator scratch
            + 2 * tm * n * 2     # double-buffered bf16 adjacency row block
            + 2 * tm * CPAD * 4  # double-buffered f32 output block
            + 4 * MIB)           # Mosaic internal scratch headroom


def _pick_stream_tm(n, budget, max_tm):
    for tm in (1024, 512, 256, 128, 64, 32, 16, 8):
        if tm > max_tm or n % tm != 0:
            continue
        if _stream_need_bytes(n, tm) <= budget:
            return tm
    return None


def _pick_mlp_tm(n):
    for tm in (512, 256, 128):
        if n % tm == 0 and n // tm >= 2:
            return tm
    return n


# --------------------------------------------------------------------------
# Setup glue
# --------------------------------------------------------------------------
def _build_norm_adj(n, edge_index):
    """gcn_norm as a dense propagation matrix: one GPR step is x <- A_hat @ x."""
    src, dst = edge_index[0], edge_index[1]
    a = jnp.zeros((n, n), jnp.float32)
    a = a.at[src, dst].set(1.0)
    diag = jnp.arange(n)
    a = a.at[diag, diag].set(1.0)                  # add self loops
    deg = jnp.sum(a, axis=0)                       # in-degree incl. self loop
    dinv = 1.0 / jnp.sqrt(deg)
    # out[t] = sum_s dinv[t] * A[s,t] * dinv[s] * x[s]  ->  A_hat = D^-1/2 A^T D^-1/2
    return dinv[:, None] * a.T * dinv[None, :]


def gprgnn_forward(x, edge_index, params, *, force_streamed=False, max_tm=1024):
    """x: (N, F) float32, edge_index: (2, E) int32."""
    n, f = x.shape
    assert n % 8 == 0, "node count must be a multiple of 8 (pad the graph)"
    # TODO(synk): pad N up to a multiple of the row-block size for ragged graphs.
    w1, b1, w2, b2, temp = params

    adj = _build_norm_adj(n, edge_index).astype(jnp.bfloat16)  # only O(N^2) tensor
    x_bf = x.astype(jnp.bfloat16)
    w1t = w1.T.astype(jnp.bfloat16)                            # (F, 128)
    b1r = b1.reshape(1, HIDDEN).astype(jnp.float32)
    w2t_pad = (jnp.zeros((HIDDEN, CPAD), jnp.float32)
               .at[:, :NUM_CLASSES].set(w2.T)).astype(jnp.bfloat16)
    b2_pad = (jnp.zeros((1, CPAD), jnp.float32)
              .at[:, :NUM_CLASSES].set(b2.reshape(1, NUM_CLASSES)))

    budget = _vmem_budget_bytes()

    # ---- kernel 1: MLP, node-row parallel, lane-dense (N, 128) bf16 output ----
    tm1 = _pick_mlp_tm(n)
    z0 = pl.pallas_call(
        mlp_kernel,
        out_shape=jax.ShapeDtypeStruct((n, CPAD), jnp.bfloat16),
        grid=(n // tm1,),
        in_specs=[
            pl.BlockSpec((tm1, f), lambda j: (j, 0)),         # x row block
            pl.BlockSpec((f, HIDDEN), lambda j: (0, 0)),      # W1^T (resident)
            pl.BlockSpec((1, HIDDEN), lambda j: (0, 0)),      # b1
            pl.BlockSpec((HIDDEN, CPAD), lambda j: (0, 0)),   # W2^T (padded)
            pl.BlockSpec((1, CPAD), lambda j: (0, 0)),        # b2 (padded)
        ],
        out_specs=pl.BlockSpec((tm1, CPAD), lambda j: (j, 0)),
        compiler_params=pltpu.CompilerParams(
            dimension_semantics=("parallel",)),
    )(x_bf, w1t, b1r, w2t_pad, b2_pad)

    # ---- kernel 2: GPR propagation + log_softmax ----
    resident = (not force_streamed) and (_resident_need_bytes(n) <= budget)

    if resident:
        # Whole adjacency resident in VMEM; single invocation, adjacency read
        # from HBM once, logits written to HBM once.
        vmem_limit = int(min(budget, max(2 * _resident_need_bytes(n), 16 * MIB)))
        logits_pad = pl.pallas_call(
            prop_resident_kernel,
            out_shape=jax.ShapeDtypeStruct((n, CPAD), jnp.float32),
            in_specs=[
                pl.BlockSpec(memory_space=pltpu.MemorySpace.SMEM),   # gammas
                pl.BlockSpec(memory_space=pltpu.MemorySpace.VMEM),   # z0 (bf16)
                pl.BlockSpec(memory_space=pltpu.MemorySpace.VMEM),   # adjacency
            ],
            out_specs=pl.BlockSpec(memory_space=pltpu.MemorySpace.VMEM),
            scratch_shapes=[pltpu.VMEM((n, CPAD), jnp.bfloat16)],    # z scratch
            compiler_params=pltpu.CompilerParams(vmem_limit_bytes=vmem_limit),
        )(temp, z0, adj)
    else:
        tm = _pick_stream_tm(n, budget, max_tm)
        assert tm is not None, "graph too large for the streamed kernel's VMEM budget"
        jblocks = n // tm
        vmem_limit = int(min(budget, max(2 * _stream_need_bytes(n, tm), 16 * MIB)))

        # Output block pinned to (0,0) until the final propagation step, so the
        # logits are only flushed to HBM jblocks times (not K*jblocks).
        if K > 1:
            out_map = lambda k, j: (j * (k // (K - 1)), 0)
        else:
            out_map = lambda k, j: (j, 0)

        logits_pad = pl.pallas_call(
            prop_stream_kernel,
            out_shape=jax.ShapeDtypeStruct((n, CPAD), jnp.float32),
            grid=(K, jblocks),                                    # k outer, rows inner
            in_specs=[
                pl.BlockSpec(memory_space=pltpu.MemorySpace.SMEM),    # gammas
                pl.BlockSpec((n, CPAD), lambda k, j: (0, 0)),         # z0 (resident, bf16)
                pl.BlockSpec((tm, n), lambda k, j: (j, 0)),           # adj row block
            ],
            out_specs=pl.BlockSpec((tm, CPAD), out_map),
            scratch_shapes=[
                pltpu.VMEM((2 * n, CPAD), jnp.bfloat16),              # z ping-pong
                pltpu.VMEM((n, CPAD), jnp.float32),                   # hidden accum
            ],
            compiler_params=pltpu.CompilerParams(
                # step k needs the complete z of step k-1, so both axes must stay
                # sequential (the row axis cannot be split across megacore TCs).
                dimension_semantics=("arbitrary", "arbitrary"),
                vmem_limit_bytes=vmem_limit),
        )(temp, z0, adj)

    logits = logits_pad[:, :NUM_CLASSES]
    pred = jnp.argmax(logits, axis=1).astype(jnp.int32)
    return logits, pred


def make_params(key, in_features):
    k1, k2, k3, k4 = jax.random.split(key, 4)
    w1 = jax.random.normal(k1, (HIDDEN, in_features), jnp.float32) * 0.1
    b1 = jax.random.normal(k2, (HIDDEN,), jnp.float32) * 0.1
    w2 = jax.random.normal(k3, (NUM_CLASSES, HIDDEN), jnp.float32) * 0.1
    b2 = jax.random.normal(k4, (NUM_CLASSES,), jnp.float32) * 0.1
    # PPR init of GPR gammas: temp[k] = alpha * (1-alpha)^k, temp[K] = (1-alpha)^K
    temp_np = ALPHA * (1.0 - ALPHA) ** np.arange(K + 1)
    temp_np[-1] = (1.0 - ALPHA) ** K
    temp = jnp.asarray(temp_np, jnp.float32)
    return (w1, b1, w2, b2, temp)


def reference_forward(x, edge_index, params):
    """Pure-JAX reference mirroring the kernel's bf16 MXU-operand rounding."""
    n = x.shape[0]
    w1, b1, w2, b2, temp = params
    bf = lambda a: a.astype(jnp.bfloat16).astype(jnp.float32)

    adj = bf(_build_norm_adj(n, edge_index))
    h = jnp.maximum(bf(x) @ bf(w1).T + b1, 0.0)
    z = bf(bf(h) @ bf(w2).T + b2)                 # kernel 1 emits z0 in bf16
    hidden = temp[0] * z
    for k in range(K):
        z = adj @ bf(z)
        hidden = hidden + temp[k + 1] * z
    logits = jax.nn.log_softmax(hidden, axis=1)
    pred = jnp.argmax(logits, axis=1).astype(jnp.int32)
    return logits, pred


if __name__ == "__main__":
    key = jax.random.PRNGKey(0)
    N, F = 256, 32                # nodes, input features
    NUM_RND_EDGES = 1024

    kx, ke, kp = jax.random.split(key, 3)
    x = jax.random.normal(kx, (N, F), jnp.float32)

    # deterministic directed edges: a ring plus random edges
    ring_src = jnp.arange(N, dtype=jnp.int32)
    ring_dst = (ring_src + 1) % N
    rnd = jax.random.randint(ke, (2, NUM_RND_EDGES), 0, N, jnp.int32)
    edge_index = jnp.concatenate([jnp.stack([ring_src, ring_dst]), rnd], axis=1)

    params = make_params(kp, F)

    ref_logits, ref_pred = reference_forward(x, edge_index, params)
    rl = np.asarray(ref_logits)
    top2 = np.sort(rl, axis=1)[:, -2:]
    stable = (top2[:, 1] - top2[:, 0]) > 1e-3     # non-tied reference decisions

    # Exercise both the resident-adjacency path (default for this size) and the
    # streamed multi-row-block path.
    for tag, kwargs in (("resident", {}),
                        ("streamed", {"force_streamed": True, "max_tm": 128})):
        logits, pred = gprgnn_forward(x, edge_index, params, **kwargs)
        logits = jax.block_until_ready(logits)
        pred = jax.block_until_ready(pred)

        np.testing.assert_allclose(np.asarray(logits), rl, rtol=1e-3, atol=1e-3,
                                   err_msg=f"logits mismatch ({tag})")
        np.testing.assert_array_equal(np.asarray(pred)[stable],
                                      np.asarray(ref_pred)[stable],
                                      err_msg=f"argmax mismatch ({tag})")

    print("KERNEL_OK")
</pallas_src>

<mosaic_0001>
module attributes {stable_mosaic.version = 11 : i64} {
  func.func @mlp_kernel(%arg0: i32, %arg1: memref<128x32xbf16, #tpu.memory_space<vmem>>, %arg2: memref<32x128xbf16, #tpu.memory_space<vmem>>, %arg3: memref<1x128xf32, #tpu.memory_space<vmem>>, %arg4: memref<128x128xbf16, #tpu.memory_space<vmem>>, %arg5: memref<1x128xf32, #tpu.memory_space<vmem>>, %arg6: memref<128x128xbf16, #tpu.memory_space<vmem>>) attributes {dimension_semantics = [#tpu.dimension_semantics<parallel>], iteration_bounds = array<i64: 2>, scalar_prefetch = 0 : i64, scratch_operands = 0 : i64, tpu.core_type = #tpu.core_type<tc>, window_params = [{transform_indices = @transform_0, window_bounds = array<i64: 128, 32>}, {pipeline_mode = #tpu.pipeline_mode<synchronous>, transform_indices = @transform_1, window_bounds = array<i64: 32, 128>}, {pipeline_mode = #tpu.pipeline_mode<synchronous>, transform_indices = @transform_2, window_bounds = array<i64: 1, 128>}, {pipeline_mode = #tpu.pipeline_mode<synchronous>, transform_indices = @transform_3, window_bounds = array<i64: 128, 128>}, {pipeline_mode = #tpu.pipeline_mode<synchronous>, transform_indices = @transform_4, window_bounds = array<i64: 1, 128>}, {transform_indices = @transform_5, window_bounds = array<i64: 128, 128>}]} {
    %c0 = arith.constant 0 : index
    %c0_0 = arith.constant 0 : index
    %0 = vector.load %arg1[%c0, %c0_0] : memref<128x32xbf16, #tpu.memory_space<vmem>>, vector<128x32xbf16>
    %c0_1 = arith.constant 0 : index
    %c0_2 = arith.constant 0 : index
    %1 = vector.load %arg2[%c0_1, %c0_2] : memref<32x128xbf16, #tpu.memory_space<vmem>>, vector<32x128xbf16>
    %cst = arith.constant dense<0.000000e+00> : vector<128x128xf32>
    %2 = tpu.matmul %0, %1, %cst {dimension_numbers = #tpu.dot_dimension_numbers<[1], [0], [0], [1], [0, 0, 1, 1], [], []>} : vector<128x32xbf16>, vector<32x128xbf16>, vector<128x128xf32> -> vector<128x128xf32>
    %c0_3 = arith.constant 0 : index
    %c0_4 = arith.constant 0 : index
    %3 = vector.load %arg3[%c0_3, %c0_4] : memref<1x128xf32, #tpu.memory_space<vmem>>, vector<1x128xf32>
    %4 = vector.broadcast %3 : vector<1x128xf32> to vector<128x128xf32>
    %5 = arith.addf %2, %4 : vector<128x128xf32>
    %cst_5 = arith.constant 0.000000e+00 : f32
    %6 = vector.broadcast %cst_5 : f32 to vector<128x128xf32>
    %7 = arith.maximumf %5, %6 : vector<128x128xf32>
    %8 = arith.truncf %7 : vector<128x128xf32> to vector<128x128xbf16>
    %c0_6 = arith.constant 0 : index
    %c0_7 = arith.constant 0 : index
    %9 = vector.load %arg4[%c0_6, %c0_7] : memref<128x128xbf16, #tpu.memory_space<vmem>>, vector<128x128xbf16>
    %cst_8 = arith.constant dense<0.000000e+00> : vector<128x128xf32>
    %10 = tpu.matmul %8, %9, %cst_8 {dimension_numbers = #tpu.dot_dimension_numbers<[1], [0], [0], [1], [0, 0, 1, 1], [], []>} : vector<128x128xbf16>, vector<128x128xbf16>, vector<128x128xf32> -> vector<128x128xf32>
    %c0_9 = arith.constant 0 : index
    %c0_10 = arith.constant 0 : index
    %11 = vector.load %arg5[%c0_9, %c0_10] : memref<1x128xf32, #tpu.memory_space<vmem>>, vector<1x128xf32>
    %12 = vector.broadcast %11 : vector<1x128xf32> to vector<128x128xf32>
    %13 = arith.addf %10, %12 : vector<128x128xf32>
    %14 = arith.truncf %13 : vector<128x128xf32> to vector<128x128xbf16>
    %c0_11 = arith.constant 0 : index
    %c0_12 = arith.constant 0 : index
    %15 = vector.load %arg6[%c0_11, %c0_12] : memref<128x128xbf16, #tpu.memory_space<vmem>>, vector<128x128xbf16>
    tpu.vector_store %arg6[%c0_11, %c0_12], %14 {strides = array<i32>} : memref<128x128xbf16, #tpu.memory_space<vmem>>, vector<128x128xbf16>,
    return
  }
  func.func @transform_0(%arg0: i32) -> (i32, i32) {
    %c0_i32 = arith.constant 0 : i32
    %c0_i32_0 = arith.constant 0 : i32
    return %arg0, %c0_i32 : i32, i32
  }
  func.func @transform_1(%arg0: i32) -> (i32, i32) {
    %c0_i32 = arith.constant 0 : i32
    %c0_i32_0 = arith.constant 0 : i32
    %c0_i32_1 = arith.constant 0 : i32
    return %c0_i32, %c0_i32_0 : i32, i32
  }
  func.func @transform_2(%arg0: i32) -> (i32, i32) {
    %c0_i32 = arith.constant 0 : i32
    %c0_i32_0 = arith.constant 0 : i32
    %c0_i32_1 = arith.constant 0 : i32
    return %c0_i32, %c0_i32_0 : i32, i32
  }
  func.func @transform_3(%arg0: i32) -> (i32, i32) {
    %c0_i32 = arith.constant 0 : i32
    %c0_i32_0 = arith.constant 0 : i32
    %c0_i32_1 = arith.constant 0 : i32
    return %c0_i32, %c0_i32_0 : i32, i32
  }
  func.func @transform_4(%arg0: i32) -> (i32, i32) {
    %c0_i32 = arith.constant 0 : i32
    %c0_i32_0 = arith.constant 0 : i32
    %c0_i32_1 = arith.constant 0 : i32
    return %c0_i32, %c0_i32_0 : i32, i32
  }
  func.func @transform_5(%arg0: i32) -> (i32, i32) {
    %c0_i32 = arith.constant 0 : i32
    %c0_i32_0 = arith.constant 0 : i32
    return %arg0, %c0_i32 : i32, i32
  }
}

</mosaic_0001>

<bundles_post_ra>
// kernel: tpu_custom_call.1
= control target key start
LH: loop header
LB: loop body
LE: loop exit
PB: predicated region body
PF: predicated region fallthrough
CT: control target
= control target key end

     0   :  { %10 = vsyncpa [#allocation3], 0  ;;  %s1317_s0 = inlined_call_operand.vmem [shape: bf16[256,32], index: 0, kind: input, shape index: {}]   ;;  %s1318_s1 = inlined_call_operand.vmem [shape: bf16[32,128], index: 1, kind: input, shape index: {}]   ;;  %s1319_s2 = inlined_call_operand.vmem [shape: f32[1,128], index: 2, kind: input, shape index: {}]   ;;  %s1320_s3 = inlined_call_operand.vmem [shape: bf16[128,128], index: 3, kind: input, shape index: {}]   ;;  %s1321_s4 = inlined_call_operand.vmem [shape: f32[1,128], index: 4, kind: input, shape index: {}]   ;;  %s1322_s5 = inlined_call_operand.hbm [shape: bf16[256,128], index: 5, kind: output, shape index: {}]  }
   0x1   :  { %12 = vsyncpa [#allocation3 + $0x1], 0  ;;  %s1146_s18 = smov 0   ;;  %s1148_s19 = smov 0  }
   0x2   :  { %s1150_s20 = smov 0   ;;  %s1152_s21 = smov 0  }
   0x3 LB: > { %s1167_s22 = sadd.s32 4294967295, %s1111_s21   ;;  %s776_s23 = sadd.s32 4294967294, %s1111_s21   ;;  %s1111_s21 = sphi %s1152_s21, %s1328_s21   ;;  %s1107_s20 = sphi %s1150_s20, %s1327_s20   ;;  %s1103_s19 = sphi %s1148_s19, %s1326_s19   ;;  %s1099_s18 = sphi %s1146_s18, %s1325_s18  }
   0x4   : > { %s1171_s24 = sadd.s32 1, %s1111_s21   ;;  %s135_s25 = sadd.s32 1, %s1107_s20 }
   0x5   : > { %s132_s26 = ssub.s32 %s1111_s21, %s1171_s24  ;;  %p145_p0 = scmp.ne.s32.totalorder %s1107_s20, %s1103_s19 }
   0x6   : > { %p133_p1 = scmp.eq.s32.totalorder %s132_s26, 0  ;;  %p146_p2 = scmp.eq.s32.totalorder %s1167_s22, 1 }
   0x7   : > { %p151_p3 = scmp.ne.s32.totalorder %s1103_s19, %s1099_s18  ;;  %p152_p4 = scmp.eq.s32.totalorder %s776_s23, 1 }
   0x8   : > { %s1182_s27 = scalar_select %p133_p1, %s1107_s20, %s135_s25  }
   0x9   : > { %p1184_p5 = por %p146_p2, %p145_p0  ;;  %p1188_p6 = por %p152_p4, %p151_p3 }
   0xa   : > { %p779_p7 = scmp.ge.s32.totalorder %s1111_s21, 1  ;;  %p191_p8 = scmp.lt.s32.totalorder %s1111_s21, 3 }
   0xc   : > { %p192_p9 = pnand %p779_p7, %p191_p8 }
   0xd   : > { %v1031_v0 = vld [vmem:[%s1318_s1] sm:$0xff] (!%p192_p9)   ;;  %s781_s7 = sshll.u32 (!%p192_p9), %s1167_s22, 4  ;;  %v1032_v1 = vld [vmem:[%s1318_s1 + $0x8] sm:$0xff] (!%p192_p9)   ;;  %vm306_vm0 = vcmask (!%p192_p9), 261120   ;;  %v1043_v4 = vld [vmem:[%s1320_s3 + $0x10] sm:$0xff] (!%p192_p9)   ;;  %s216_s16 = sand.u32 (!%p192_p9), 1, %s1103_s19  }
   0xe   : > { %195 = sbr.rel (%p192_p9) target bundleno = 506 (0x1fa), region = 40  ;;  %p220_p10 = scmp.lt.s32.totalorder (!%p192_p9), %s781_s7, 31  ;;  %922 = vmatprep.subr.bf16.mxu0 (!%p192_p9), %v1031_v0  ;;  %v1041_v2 = vld [vmem:[%s1320_s3] sm:$0xff] (!%p192_p9)   ;;  %v1042_v3 = vld [vmem:[%s1320_s3 + $0x8] sm:$0xff] (!%p192_p9)   ;;  %v1044_v8 = vld [vmem:[%s1320_s3 + $0x18] sm:$0xff] (!%p192_p9)  }
   0xf   : > { %923 = vmatpush3.bf16.msra.mxu0 (!%p192_p9), %v1031_v0  ;;  %974 = vmatprep.subr.bf16.mxu1 (!%p192_p9), %v1041_v2  ;;  %v1045_v10 = vld [vmem:[%s1320_s3 + $0x20] sm:$0xff] (!%p192_p9)   ;;  %v1046_v12 = vld [vmem:[%s1320_s3 + $0x28] sm:$0xff] (!%p192_p9)   ;;  %v1047_v16 = vld [vmem:[%s1320_s3 + $0x30] sm:$0xff] (!%p192_p9)   ;;  %s780_s25 = sshll.u32 (!%p192_p9), %s216_s16, 6  ;;  %s848_s30 = sshll.u32 (!%p192_p9), %s1167_s22, 10 }
  0x10   : > { %924 = vmatprep.subr.bf16.mxu0 (!%p192_p9), %v1032_v1  ;;  %982 = vmatpush3.bf16.msra.mxu1 (!%p192_p9), %v1041_v2  ;;  %v1048_v17 = vld [vmem:[%s1320_s3 + $0x38] sm:$0xff] (!%p192_p9)   ;;  %v783_v18 = vld [vmem:[%s1319_s2] ss:$0 sm:$0xff] (!%p192_p9)  ;;  %s1255_s26 = scalar_lea.vmem (!%p192_p9), [#allocation2], %s780_s25  ;;  %s1268_s9 = scalar_lea.hbm (!%p192_p9), %s1322_s5, %s848_s30 }
  0x11   : > { %975 = vmatprep.subr.bf16.mxu1 (!%p192_p9), %v1042_v3  ;;  %s714_s6 = sshll.u32 (!%p192_p9), %s1255_s26, 4  ;;  %s1276_s22 = scalar_lea.sflag (!%p192_p9), [#allocation3], %s216_s16  ;;  %s1270_s6 = int_to_ptr.vmem [resolvable:$true] %s714_s6 }
  0x12   : > { %s1049_s10 = scalar_lea.vmem (!%p192_p9), %s1270_s6, 1024  ;;  %s1113_s11 = smov (!%p192_p9), [#allocation2]  }
  0x13   : > { %925 = vmatpush3.bf16.msra.mxu0 (!%p192_p9), %v1032_v1  ;;  %p1050_p11 = scmp.ne.s32.totalorder (!%p192_p9), %s1270_s6, %s1049_s10  ;;  %s1053_s12 = sshll.u32 (!%p192_p9), %s1113_s11, 4  ;;  %s1054_s12 = int_to_ptr.vmem [resolvable:$false] %s1053_s12 }
  0x14   : > { %942 = vmatprep.subr.bf16.mxu0 (!%p192_p9), %v1041_v2  ;;  %983 = vmatpush3.bf16.msra.mxu1 (!%p192_p9), %v1042_v3  ;;  %s1055_s13 = scalar_lea.vmem (!%p192_p9), %s1054_s12, 2048  ;;  %p1056_p0 = scmp.lt.s32.totalorder (!%p192_p9), %s1270_s6, %s1054_s12 }
  0x15   : > { %s1330_s7 = smov (!%p220_p10, %s781_s7), 31  ;;  %976 = vmatprep.subr.bf16.mxu1 %v1043_v4  ;;  %p1051_p12 = pnand %p1050_p11, %p1184_p5 }
  0x16   : > { %s782_s14 = sshll.u32 %s1330_s7, 2  ;;  %p1057_p1 = scmp.lt.s32.totalorder %s1055_s13, %s1049_s10 }
  0x17   : > { %s1210_s17 = scalar_lea.vmem %s1317_s0, %s782_s14  ;;  %p1052_p13 = pneg %p1051_p12 }
  0x18   : > { %v1033_v5 = vld [vmem:[%s1210_s17] sm:$0xff]   ;;  %v1034_v6 = vld [vmem:[%s1210_s17 + $0x8] sm:$0xff]   ;;  %v1035_v7 = vld [vmem:[%s1210_s17 + $0x10] sm:$0xff]   ;;  %984 = vmatpush3.bf16.msra.mxu1 %v1043_v4  ;;  %p1058_p2 = por %p1057_p1, %p1056_p0 }
  0x19   : > { %926 = vmatprep.mubr.msk.bf16.mxu0 %vm306_vm0, %v1033_v5  ;;  %v1036_v9 = vld [vmem:[%s1210_s17 + $0x18] sm:$0xff]   ;;  %977 = vmatprep.subr.bf16.mxu1 %v1044_v8  ;;  %v1037_v11 = vld [vmem:[%s1210_s17 + $0x20] sm:$0xff]   ;;  %v1038_v13 = vld [vmem:[%s1210_s17 + $0x28] sm:$0xff]  }
  0x1a   : > { %927 = vmatmul.mubr.msk.bf16.vlgmr.msra.gmra.mrb[0].mxu0 %vm306_vm0, %v1034_v6  ;;  %v1039_v14 = vld [vmem:[%s1210_s17 + $0x30] sm:$0xff]   ;;  %v1040_v15 = vld [vmem:[%s1210_s17 + $0x38] sm:$0xff]   ;;  %p1059_p3 = pnand %p1058_p2, %p1052_p13 }
  0x1b   : > { %930 = vmatprep.mubr.msk.bf16.mxu0 %vm306_vm0, %v1035_v7  ;;  %943 = vmatpush3.bf16.msra.mxu0 %v1041_v2 }
  0x1c   : > { %944 = vmatprep.subr.bf16.mxu0 %v1042_v3  ;;  %985 = vmatpush3.bf16.msra.mxu1 %v1044_v8 }
  0x1d   : > { %978 = vmatprep.subr.bf16.mxu1 %v1045_v10 }
  0x1f   : > { %945 = vmatpush3.bf16.msra.mxu0 %v1042_v3 }
  0x20   : > { %946 = vmatprep.subr.bf16.mxu0 %v1043_v4  ;;  %986 = vmatpush3.bf16.msra.mxu1 %v1045_v10 }
  0x21   : > { %979 = vmatprep.subr.bf16.mxu1 %v1046_v12 }
  0x22   : > { %931 = vmatmul.mubr.msk.bf16.gmra.mrb[4].mxu0 %vm306_vm0, %v1036_v9 }
  0x23   : > { %934 = vmatprep.mubr.msk.bf16.mxu0 %vm306_vm0, %v1037_v11  ;;  %947 = vmatpush3.bf16.msra.mxu0 %v1043_v4 }
  0x24   : > { %948 = vmatprep.subr.bf16.mxu0 %v1044_v8  ;;  %987 = vmatpush3.bf16.msra.mxu1 %v1046_v12 }
  0x25   : > { %980 = vmatprep.subr.bf16.mxu1 %v1047_v16 }
  0x27   : > { %949 = vmatpush3.bf16.msra.mxu0 %v1044_v8 }
  0x28   : > { %950 = vmatprep.subr.bf16.mxu0 %v1045_v10  ;;  %988 = vmatpush3.bf16.msra.mxu1 %v1047_v16 }
  0x29   : > { %981 = vmatprep.subr.bf16.mxu1 %v1048_v17 }
  0x2a   : > { %935 = vmatmul.mubr.msk.bf16.gmra.mrb[8].mxu0 %vm306_vm0, %v1038_v13 }
  0x2b   : > { %938 = vmatprep.mubr.msk.bf16.mxu0 %vm306_vm0, %v1039_v14  ;;  %951 = vmatpush3.bf16.msra.mxu0 %v1045_v10 }
  0x2c   : > { %952 = vmatprep.subr.bf16.mxu0 %v1046_v12  ;;  %989 = vmatpush3.bf16.msra.mxu1 %v1048_v17 }
  0x2f   : > { %953 = vmatpush3.bf16.msra.mxu0 %v1046_v12  ;;  %v802_v12 = vld [vmem:[%s1321_s4] ss:$0 sm:$0xff] }
  0x30   : > { %954 = vmatprep.subr.bf16.mxu0 %v1047_v16 }
  0x32   : > { %939 = vmatmul.mubr.msk.bf16.gmra.mrb[12].mxu0 %vm306_vm0, %v1040_v15 }
  0x33   : > { %955 = vmatpush3.bf16.msra.mxu0 %v1047_v16 }
  0x34   : > { %956 = vmatprep.subr.bf16.mxu0 %v1048_v17 }
  0x37   : > { %957 = vmatpush3.bf16.msra.mxu0 %v1048_v17 }
  0xed   : > { %v928_v19 = vpop.f32.mrb[0].mxu0 }
  0xee   : > { %v374_v20 = vadd.f32 %v928_v19, %v783_v18  ;;  %v365_v21 = vpop.f32.mrb[1].mxu0 }
  0xef   : > { %v366_v22 = vadd.f32 %v783_v18, %v365_v21  ;;  %v929_v23 = vpop.f32.mrb[2].mxu0 }
  0xf0   : > { %v377_v24 = vadd.f32 %v929_v23, %v783_v18  ;;  %v368_v25 = vpop.f32.mrb[3].mxu0  ;;  %v430_v27 = vmax.f32 %v374_v20, 0.0 }
  0xf1   : > { %v369_v26 = vadd.f32 %v783_v18, %v368_v25  ;;  %v428_v29 = vmax.f32 %v366_v22, 0.0 }
  0xf2   : > { %v431_v28 = vmax.f32 %v377_v24, 0.0 }
  0xf3   : > { %v429_v30 = vmax.f32 %v369_v26, 0.0 }
  0xf4   : > { %v445_v31 = vpack.c.bf16 %v431_v28, %v430_v27 }
  0xf5   : > { %v444_v32 = vpack.c.bf16 %v429_v30, %v428_v29  ;;  %v932_v33 = vpop.f32.mrb[4].mxu0 }
  0xf6   : > { %v390_v34 = vadd.f32 %v932_v33, %v783_v18  ;;  %v381_v35 = vpop.f32.mrb[5].mxu0 }
  0xf7   : > { %v382_v36 = vadd.f32 %v783_v18, %v381_v35  ;;  %v933_v37 = vpop.f32.mrb[6].mxu0  ;;  %958 = vmatprep.mubr.bf16.mxu0 %v444_v32 }
  0xf8   : > { %v393_v38 = vadd.f32 %v933_v37, %v783_v18  ;;  %v384_v39 = vpop.f32.mrb[7].mxu0  ;;  %959 = vmatmul.mubr.bf16.vlgmr.msra.gmra.mrb[16].mxu0 %v445_v31  ;;  %v434_v41 = vmax.f32 %v390_v34, 0.0 }
  0xf9   : > { %v385_v40 = vadd.f32 %v783_v18, %v384_v39  ;;  %v432_v43 = vmax.f32 %v382_v36, 0.0 }
  0xfa   : > { %v435_v42 = vmax.f32 %v393_v38, 0.0 }
  0xfb   : > { %v433_v44 = vmax.f32 %v385_v40, 0.0 }
  0xfc   : > { %v447_v45 = vpack.c.bf16 %v435_v42, %v434_v41 }
  0xfd   : > { %v936_v46 = vpop.f32.mrb[8].mxu0  ;;  %v446_v47 = vpack.c.bf16 %v433_v44, %v432_v43 }
  0xfe   : > { %v406_v48 = vadd.f32 %v936_v46, %v783_v18  ;;  %v397_v49 = vpop.f32.mrb[9].mxu0 }
  0xff   : > { %v398_v50 = vadd.f32 %v783_v18, %v397_v49  ;;  %v937_v51 = vpop.f32.mrb[10].mxu0  ;;  %962 = vmatprep.mubr.bf16.mxu1 %v446_v47 }
 0x100   : > { %v409_v52 = vadd.f32 %v937_v51, %v783_v18  ;;  %v400_v53 = vpop.f32.mrb[11].mxu0  ;;  %963 = vmatmul.mubr.bf16.vlgmr.msra.gmra.mrb[0].mxu1 %v447_v45  ;;  %v438_v55 = vmax.f32 %v406_v48, 0.0 }
 0x101   : > { %v401_v54 = vadd.f32 %v783_v18, %v400_v53  ;;  %v436_v57 = vmax.f32 %v398_v50, 0.0 }
 0x102   : > { %v439_v56 = vmax.f32 %v409_v52, 0.0 }
 0x103   : > { %v437_v58 = vmax.f32 %v401_v54, 0.0 }
 0x104   : > { %v449_v59 = vpack.c.bf16 %v439_v56, %v438_v55 }
 0x105   : > { %v448_v60 = vpack.c.bf16 %v437_v58, %v436_v57  ;;  %v940_v61 = vpop.f32.mrb[12].mxu0 }
 0x106   : > { %v422_v62 = vadd.f32 %v940_v61, %v783_v18  ;;  %v413_v63 = vpop.f32.mrb[13].mxu0 }
 0x107   : > { %v414_v0 = vadd.f32 %v783_v18, %v413_v63  ;;  %v941_v1 = vpop.f32.mrb[14].mxu0  ;;  %966 = vmatprep.mubr.bf16.mxu1 %v448_v60 }
 0x108   : > { %v425_v2 = vadd.f32 %v941_v1, %v783_v18  ;;  %v416_v3 = vpop.f32.mrb[15].mxu0  ;;  %967 = vmatmul.mubr.bf16.gmra.mrb[4].mxu1 %v449_v59  ;;  %v442_v5 = vmax.f32 %v422_v62, 0.0 }
 0x109   : > { %v417_v4 = vadd.f32 %v783_v18, %v416_v3  ;;  %v440_v7 = vmax.f32 %v414_v0, 0.0 }
 0x10a   : > { %v443_v6 = vmax.f32 %v425_v2, 0.0 }
 0x10b   : > { %v441_v8 = vmax.f32 %v417_v4, 0.0 }
 0x10c   : > { %v451_v9 = vpack.c.bf16 %v443_v6, %v442_v5 }
 0x10d   : > { %v450_v10 = vpack.c.bf16 %v441_v8, %v440_v7 }
 0x10f   : > { %970 = vmatprep.mubr.bf16.mxu1 %v450_v10 }
 0x110   : > { %971 = vmatmul.mubr.bf16.gmra.mrb[8].mxu1 %v451_v9 }
 0x1cb   : > { %v960_v11 = vpop.f32.mrb[16].mxu0 }
 0x1cc   : > { %v557_v13 = vpop.f32.mrb[17].mxu0  ;;  %v566_v15 = vadd.f32 %v960_v11, %v802_v12 }
 0x1cd   : > { %v961_v14 = vpop.f32.mrb[18].mxu0  ;;  %v558_v18 = vadd.f32 %v802_v12, %v557_v13 }
 0x1ce   : > { %v569_v16 = vadd.f32 %v961_v14, %v802_v12  ;;  %v560_v17 = vpop.f32.mrb[19].mxu0 }
 0x1cf   : > { %v561_v19 = vadd.f32 %v802_v12, %v560_v17 }
 0x1d0   : > { %v857_v20 = vpack.c.bf16 %v569_v16, %v566_v15 }
 0x1d1   : > { %v852_v21 = vpack.c.bf16 %v561_v19, %v558_v18 }
 0x1d2   : > { %889 = vst [vmem:[%s1255_s26 + $0x8] sm:$0xff] %v857_v20  }
 0x1d3   : > { %853 = vst [vmem:[%s1255_s26] sm:$0xff] %v852_v21   ;;  %v964_v22 = vpop.f32.mrb[0].mxu1 }
 0x1d4   : > { %v573_v23 = vpop.f32.mrb[1].mxu1  ;;  %v582_v25 = vadd.f32 %v964_v22, %v802_v12 }
 0x1d5   : > { %v965_v24 = vpop.f32.mrb[2].mxu1  ;;  %v574_v28 = vadd.f32 %v802_v12, %v573_v23 }
 0x1d6   : > { %v585_v26 = vadd.f32 %v965_v24, %v802_v12  ;;  %v576_v27 = vpop.f32.mrb[3].mxu1 }
 0x1d7   : > { %v577_v29 = vadd.f32 %v802_v12, %v576_v27 }
 0x1d8   : > { %v867_v30 = vpack.c.bf16 %v585_v26, %v582_v25 }
 0x1d9   : > { %v862_v31 = vpack.c.bf16 %v577_v29, %v574_v28 }
 0x1da   : > { %891 = vst [vmem:[%s1255_s26 + $0x18] sm:$0xff] %v867_v30  }
 0x1db   : > { %890 = vst [vmem:[%s1255_s26 + $0x10] sm:$0xff] %v862_v31   ;;  %v968_v32 = vpop.f32.mrb[4].mxu1 }
 0x1dc   : > { %v589_v33 = vpop.f32.mrb[5].mxu1  ;;  %v598_v35 = vadd.f32 %v968_v32, %v802_v12 }
 0x1dd   : > { %v969_v34 = vpop.f32.mrb[6].mxu1  ;;  %v590_v38 = vadd.f32 %v802_v12, %v589_v33 }
 0x1de   : > { %v601_v36 = vadd.f32 %v969_v34, %v802_v12  ;;  %v592_v37 = vpop.f32.mrb[7].mxu1 }
 0x1df   : > { %v593_v39 = vadd.f32 %v802_v12, %v592_v37 }
 0x1e0   : > { %v877_v40 = vpack.c.bf16 %v601_v36, %v598_v35 }
 0x1e1   : > { %v872_v41 = vpack.c.bf16 %v593_v39, %v590_v38 }
 0x1e2   : > { %893 = vst [vmem:[%s1255_s26 + $0x28] sm:$0xff] %v877_v40  }
 0x1e3   : > { %892 = vst [vmem:[%s1255_s26 + $0x20] sm:$0xff] %v872_v41   ;;  %v972_v42 = vpop.f32.mrb[8].mxu1 }
 0x1e4   : > { %v605_v43 = vpop.f32.mrb[9].mxu1  ;;  %v614_v45 = vadd.f32 %v972_v42, %v802_v12 }
 0x1e5   : > { %v973_v44 = vpop.f32.mrb[10].mxu1  ;;  %v606_v48 = vadd.f32 %v802_v12, %v605_v43 }
 0x1e6   : > { %v617_v46 = vadd.f32 %v973_v44, %v802_v12  ;;  %v608_v47 = vpop.f32.mrb[11].mxu1 }
 0x1e7   : > { %v609_v49 = vadd.f32 %v802_v12, %v608_v47 }
 0x1e8   : > { %v887_v50 = vpack.c.bf16 %v617_v46, %v614_v45 }
 0x1e9   : > { %v882_v51 = vpack.c.bf16 %v609_v49, %v606_v48 }
 0x1ea   : > { %895 = vst [vmem:[%s1255_s26 + $0x38] sm:$0xff] %v887_v50  }
 0x1eb   : > { %894 = vst [vmem:[%s1255_s26 + $0x30] sm:$0xff] %v882_v51  }
 0x1ec   : > { %1062 = shalt.err (!%p1059_p3)
}
 0x1ed   : > { %s1063_s14 = scalar_lea.hbm %s1268_s9, 1024  ;;  %s1067_s17 = scalar_lea.hbm %s1322_s5, 2048 }
 0x1ee   : > { %p1064_p4 = scmp.ne.s32.totalorder %s1268_s9, %s1063_s14  ;;  %p1068_p9 = scmp.lt.u32.totalorder %s1268_s9, %s1322_s5 }
 0x1ef   : > { %p1069_p10 = scmp.lt.u32.totalorder %s1067_s17, %s1063_s14  ;;  %p1071_p12 = scmp.lt.u32.totalorder %s1063_s14, %s1268_s9 }
 0x1f0   : > { %p1065_p7 = pnand %p1064_p4, %p1184_p5 }
 0x1f1   : > { %p1070_p11 = por %p1069_p10, %p1068_p9 }
 0x1f2   : > { %p1066_p8 = pneg %p1065_p7 }
 0x1f3   : > { %p1072_p13 = por %p1071_p12, %p1070_p11 }
 0x1f5   : > { %p1073_p0 = pnand %p1072_p13, %p1066_p8 }
 0x1f7   : > { %1076 = shalt.err (!%p1073_p0)
}
 0x1f8   : > { %s1114_s26 = smov 64   ;;  %s1115_s30 = smov 4  }
 0x1f9   : > { %990 = dma.vmem_to_hbm [thread:$0]  (%p1184_p5), %s1270_s6, 1024, %s1268_s9, %s1276_s22, %s1114_s26, %s1114_s26, %s1115_s30  }
 0x1fa PF: > { %p996_p1 = scmp.ge.s32.totalorder %s1111_s21, 2  ;;  %s729_s7 = sand.u32 1, %s1099_s18  }
 0x1fb   : > { %s730_s8 = scalar_lea.sflag [#allocation3], %s729_s7 }
 0x1fc   : > { %p993_p2 = pnand %p996_p1, %p1188_p6 }
 0x1fe   : > { %1094 = dma.done.wait (!%p993_p2), %s730_s8, 1024  }
 0x1ff   : > { %1096 = vsyncadd (!%p993_p2), %s730_s8, 4294966272  ;;  %p15_p3 = scmp.ge.s32.totalorder %s1171_s24, 4   ;;  %s1325_s18 = smov %s1103_s19 }
 0x200   : > { %s1326_s19 = smov %s1107_s20  ;;  %s1327_s20 = smov %s1182_s27 }
 0x201   : > { %s1328_s21 = smov %s1171_s24  ;;  %17 = sbr.rel (!%p15_p3) target bundleno = 3 (0x3), region = 75 }
 0x208   :  { %735 = vsyncpa [#allocation3], 1 }
 0x209   :  { %737 = vsyncpa [#allocation3 + $0x1], 1 }

</bundles_post_ra>
